<compile_context>
chip_gen: v7x
topology: tpu7x:2x2x1
jax: 0.10.0
libtpu: 0.0.40
codegen_flags: <defaults>
</compile_context>

<pallas_src>
import functools

import jax
import jax.numpy as jnp
from jax.experimental import pallas as pl
from jax.experimental.pallas import tpu as pltpu

# ---- Config (the original Config class is not given; fixed deterministically) ----
HIDDEN_DIM = 32
NUM_RESIDUAL_BLOCKS = 3
DROPOUT_RATE = 0.5        # eval mode -> identity
BN_EPS = 1e-5

INPUT_DIM = 16
NUM_CLASSES = 4
NUM_NODES = 16
PAD_OUT = 128             # lane-dense classifier width; sliced to NUM_CLASSES outside

# ---- static slab layout constants ----
_H = HIDDEN_DIM
OFF_WIN = 0                                        # (INPUT_DIM, H) rows
OFF_BLK = INPUT_DIM                                # per block: 4*H rows (wl1,wr1,wl2,wr2)
OFF_WG = OFF_BLK + 4 * _H * NUM_RESIDUAL_BLOCKS    # gates: H rows each
W32_ROWS = OFF_WG + _H * (NUM_RESIDUAL_BLOCKS - 1)

BIAS_ROW_BIN = 0                                   # input-proj bias
# blocks: row 1+2b = shift1[b], row 2+2b = shift2[b]
BIAS_ROW_BG0 = 1 + 2 * NUM_RESIDUAL_BLOCKS         # gate biases
BIAS_ROW_BC1 = BIAS_ROW_BG0 + (NUM_RESIDUAL_BLOCKS - 1)
BIAS_ROW_BC2 = BIAS_ROW_BC1 + 1
BIAS_ROWS = BIAS_ROW_BC2 + 1


def _vmem_spec():
    return pl.BlockSpec(memory_space=pltpu.MemorySpace.VMEM)


# ------------------------------- fused kernel ----------------------------------

def drgan_fused_kernel(x_ref, a_ref, w32_ref, w128_ref, bias_ref, o_ref, *,
                       num_blocks):
    """Entire DRGAN forward (eval) in one gridless kernel invocation."""
    H = HIDDEN_DIM
    bf16 = jnp.bfloat16
    a = a_ref[...]                                           # (N, N) bf16

    def w32(off, rows=H):
        return w32_ref[pl.ds(off, rows), :]                  # (rows, H) bf16

    def bias32(row):
        return bias_ref[pl.ds(row, 1), pl.ds(0, H)]          # (1, H) f32

    def bias128(row):
        return bias_ref[pl.ds(row, 1), :]                    # (1, 128) f32

    # input projection: x @ Win + bin
    h = (jnp.dot(x_ref[...].astype(bf16), w32(OFF_WIN, INPUT_DIM),
                 preferred_element_type=jnp.float32) + bias32(BIAS_ROW_BIN))

    def sage_bn_relu(feat, wl, wr, shift):
        # PyG SAGEConv(mean) + eval BN (folded into wl/wr/shift) + ReLU; dropout=id.
        fb = feat.astype(bf16)
        agg = jnp.dot(a, fb, preferred_element_type=jnp.float32)       # A @ x
        lin = (jnp.dot(agg.astype(bf16), wl, preferred_element_type=jnp.float32)
               + jnp.dot(fb, wr, preferred_element_type=jnp.float32)
               + shift)
        return jnp.maximum(lin, 0.0)

    prev = h
    for b in range(num_blocks):                              # static unroll
        base = OFF_BLK + 4 * H * b
        h1 = sage_bn_relu(prev, w32(base), w32(base + H), bias32(1 + 2 * b))
        # residual_conv is nn.Identity() since in_dim == out_dim == HIDDEN_DIM
        cur = sage_bn_relu(h1, w32(base + 2 * H), w32(base + 3 * H),
                           bias32(2 + 2 * b)) + prev
        if b > 0:
            g = jax.nn.sigmoid(
                jnp.dot(prev.astype(bf16), w32(OFF_WG + H * (b - 1)),
                        preferred_element_type=jnp.float32)
                + bias32(BIAS_ROW_BG0 + (b - 1)))
            cur = cur + g * (prev - cur)                     # g*prev + (1-g)*cur
        prev = cur

    # classifier: Linear -> ReLU -> Dropout(eval) -> Linear (all lane-dense, 128 wide)
    wc1 = w128_ref[pl.ds(0, H), :]                           # (H, 128) bf16
    wc2 = w128_ref[pl.ds(H, PAD_OUT), :]                     # (128, 128) bf16
    c1 = jnp.maximum(
        jnp.dot(prev.astype(bf16), wc1, preferred_element_type=jnp.float32)
        + bias128(BIAS_ROW_BC1), 0.0)
    out = (jnp.dot(c1.astype(bf16), wc2, preferred_element_type=jnp.float32)
           + bias128(BIAS_ROW_BC2))
    o_ref[...] = out.astype(o_ref.dtype)


# ------------------------------ parameter init ---------------------------------

def _linear_params(key, fan_in, fan_out, bias=True):
    k1, k2 = jax.random.split(key)
    bound = 1.0 / jnp.sqrt(jnp.float32(fan_in))
    w = jax.random.uniform(k1, (fan_in, fan_out), jnp.float32, -bound, bound)
    if not bias:
        return w
    b = jax.random.uniform(k2, (1, fan_out), jnp.float32, -bound, bound)
    return w, b


def _bn_affine(key, dim):
    k1, k2, k3, k4 = jax.random.split(key, 4)
    gamma = 1.0 + 0.1 * jax.random.normal(k1, (1, dim), jnp.float32)
    beta = 0.1 * jax.random.normal(k2, (1, dim), jnp.float32)
    running_mean = 0.1 * jax.random.normal(k3, (1, dim), jnp.float32)
    running_var = 1.0 + 0.1 * jax.random.uniform(k4, (1, dim), jnp.float32)
    # fold eval-mode BN into per-channel affine
    scale = gamma / jnp.sqrt(running_var + BN_EPS)
    shift = beta - running_mean * scale
    return scale, shift


def init_params(key):
    keys = iter(jax.random.split(key, 64))
    H = HIDDEN_DIM

    w_in, b_in = _linear_params(next(keys), INPUT_DIM, H)

    w32_rows = [w_in]                     # (INPUT_DIM, H)
    shift_rows = []                       # per block: [shift1, shift2] each (1, H)
    for _ in range(NUM_RESIDUAL_BLOCKS):
        # SAGEConv1: lin_l (with bias), lin_r (no bias)
        wl1, bl1 = _linear_params(next(keys), H, H)
        wr1 = _linear_params(next(keys), H, H, bias=False)
        s1, t1 = _bn_affine(next(keys), H)
        # SAGEConv2
        wl2, bl2 = _linear_params(next(keys), H, H)
        wr2 = _linear_params(next(keys), H, H, bias=False)
        s2, t2 = _bn_affine(next(keys), H)
        # Fold BN scale (per output channel) into each weight; bias+shift folded too.
        w32_rows += [wl1 * s1, wr1 * s1, wl2 * s2, wr2 * s2]
        shift_rows += [bl1 * s1 + t1, bl2 * s2 + t2]

    bg_rows = []
    for _ in range(NUM_RESIDUAL_BLOCKS - 1):
        wg, bg = _linear_params(next(keys), H, H)
        w32_rows.append(wg)
        bg_rows.append(bg)

    wc1, bc1 = _linear_params(next(keys), H, H // 2)
    wc2, bc2 = _linear_params(next(keys), H // 2, NUM_CLASSES)
    # Lane-pad classifier: hidden layer to 128 channels, output to 128 lanes.
    wc1p = jnp.zeros((H, PAD_OUT), jnp.float32).at[:, :H // 2].set(wc1)
    bc1p = jnp.zeros((1, PAD_OUT), jnp.float32).at[:, :H // 2].set(bc1)
    wc2p = jnp.zeros((PAD_OUT, PAD_OUT), jnp.float32).at[:H // 2, :NUM_CLASSES].set(wc2)
    bc2p = jnp.zeros((1, PAD_OUT), jnp.float32).at[:, :NUM_CLASSES].set(bc2)

    slab_w32 = jnp.concatenate(w32_rows, axis=0).astype(jnp.bfloat16)
    assert slab_w32.shape == (W32_ROWS, H)
    slab_w128 = jnp.concatenate([wc1p, wc2p], axis=0).astype(jnp.bfloat16)
    assert slab_w128.shape == (H + PAD_OUT, PAD_OUT)

    def pad128(b):
        return jnp.zeros((1, PAD_OUT), jnp.float32).at[:, :b.shape[1]].set(b)

    bias_rows = [pad128(b_in)]
    bias_rows += [pad128(r) for r in shift_rows]   # rows 1..2*NB
    bias_rows += [pad128(r) for r in bg_rows]      # gate biases
    bias_rows += [bc1p, bc2p]
    slab_bias = jnp.concatenate(bias_rows, axis=0)
    assert slab_bias.shape == (BIAS_ROWS, PAD_OUT)

    return slab_w32, slab_w128, slab_bias


# ------------------------------ forward (glue) ----------------------------------

def build_norm_adj(edge_index, num_nodes):
    """A[dst, src] = 1/in_deg(dst); rows with no incoming edges stay zero
    (matches PyG mean aggregation returning zeros). Flow: source -> target."""
    src, dst = edge_index[0], edge_index[1]
    a = jnp.zeros((num_nodes, num_nodes), jnp.float32).at[dst, src].add(1.0)
    deg = a.sum(axis=1, keepdims=True)
    return a / jnp.maximum(deg, 1.0)


@jax.jit
def drgan_forward(params, x, a_norm):
    slab_w32, slab_w128, slab_bias = params
    out_padded = pl.pallas_call(
        functools.partial(drgan_fused_kernel, num_blocks=NUM_RESIDUAL_BLOCKS),
        out_shape=jax.ShapeDtypeStruct((x.shape[0], PAD_OUT), jnp.float32),
        in_specs=[_vmem_spec()] * 5,
        out_specs=_vmem_spec(),
    )(x, a_norm.astype(jnp.bfloat16), slab_w32, slab_w128, slab_bias)
    return out_padded[:, :NUM_CLASSES]


# ----------------------------------- main ---------------------------------------

if __name__ == "__main__":
    key = jax.random.PRNGKey(0)
    k_param, k_x = jax.random.split(key)

    params = init_params(k_param)

    # Node features: (N, input_dim)
    x = jax.random.normal(k_x, (NUM_NODES, INPUT_DIM), jnp.float32)

    # Deterministic edge_index [2, E]: bidirectional ring + a few chords.
    src = list(range(NUM_NODES)) + [(i + 1) % NUM_NODES for i in range(NUM_NODES)] \
        + [0, 3, 7, 11]
    dst = [(i + 1) % NUM_NODES for i in range(NUM_NODES)] + list(range(NUM_NODES)) \
        + [8, 12, 1, 5]
    edge_index = jnp.array([src, dst], dtype=jnp.int32)

    a_norm = build_norm_adj(edge_index, NUM_NODES)

    out = drgan_forward(params, x, a_norm)
    out = jax.block_until_ready(out)
    assert out.shape == (NUM_NODES, NUM_CLASSES)
    assert bool(jnp.all(jnp.isfinite(out)))
    print("KERNEL_OK")
</pallas_src>

<mosaic_0001>
module attributes {stable_mosaic.version = 11 : i64} {
  func.func @drgan_fused_kernel(%arg0: memref<16x16xf32, #tpu.memory_space<vmem>>, %arg1: memref<16x16xbf16, #tpu.memory_space<vmem>>, %arg2: memref<464x32xbf16, #tpu.memory_space<vmem>>, %arg3: memref<160x128xbf16, #tpu.memory_space<vmem>>, %arg4: memref<11x128xf32, #tpu.memory_space<vmem>>, %arg5: memref<16x128xf32, #tpu.memory_space<vmem>>) attributes {dimension_semantics = [], scalar_prefetch = 0 : i64, scratch_operands = 0 : i64, tpu.core_type = #tpu.core_type<tc>} {
    %c0 = arith.constant 0 : index
    %c0_0 = arith.constant 0 : index
    %0 = vector.load %arg1[%c0, %c0_0] : memref<16x16xbf16, #tpu.memory_space<vmem>>, vector<16x16xbf16>
    %c0_1 = arith.constant 0 : index
    %c0_2 = arith.constant 0 : index
    %1 = vector.load %arg0[%c0_1, %c0_2] : memref<16x16xf32, #tpu.memory_space<vmem>>, vector<16x16xf32>
    %2 = arith.truncf %1 : vector<16x16xf32> to vector<16x16xbf16>
    %c0_3 = arith.constant 0 : index
    %c0_4 = arith.constant 0 : index
    %3 = vector.load %arg2[%c0_3, %c0_4] : memref<464x32xbf16, #tpu.memory_space<vmem>>, vector<16x32xbf16>
    %cst = arith.constant dense<0.000000e+00> : vector<16x32xf32>
    %4 = tpu.matmul %2, %3, %cst {dimension_numbers = #tpu.dot_dimension_numbers<[1], [0], [0], [1], [0, 0, 1, 1], [], []>} : vector<16x16xbf16>, vector<16x32xbf16>, vector<16x32xf32> -> vector<16x32xf32>
    %c0_5 = arith.constant 0 : index
    %c0_6 = arith.constant 0 : index
    %5 = vector.load %arg4[%c0_5, %c0_6] : memref<11x128xf32, #tpu.memory_space<vmem>>, vector<1x32xf32>
    %6 = vector.broadcast %5 : vector<1x32xf32> to vector<16x32xf32>
    %7 = arith.addf %4, %6 : vector<16x32xf32>
    %c16 = arith.constant 16 : index
    %c0_7 = arith.constant 0 : index
    %8 = vector.load %arg2[%c16, %c0_7] : memref<464x32xbf16, #tpu.memory_space<vmem>>, vector<32x32xbf16>
    %c48 = arith.constant 48 : index
    %c0_8 = arith.constant 0 : index
    %9 = vector.load %arg2[%c48, %c0_8] : memref<464x32xbf16, #tpu.memory_space<vmem>>, vector<32x32xbf16>
    %c1 = arith.constant 1 : index
    %c0_9 = arith.constant 0 : index
    %10 = vector.load %arg4[%c1, %c0_9] : memref<11x128xf32, #tpu.memory_space<vmem>>, vector<1x32xf32>
    %11 = arith.truncf %7 : vector<16x32xf32> to vector<16x32xbf16>
    %cst_10 = arith.constant dense<0.000000e+00> : vector<16x32xf32>
    %12 = tpu.matmul %0, %11, %cst_10 {dimension_numbers = #tpu.dot_dimension_numbers<[1], [0], [0], [1], [0, 0, 1, 1], [], []>} : vector<16x16xbf16>, vector<16x32xbf16>, vector<16x32xf32> -> vector<16x32xf32>
    %13 = arith.truncf %12 : vector<16x32xf32> to vector<16x32xbf16>
    %cst_11 = arith.constant dense<0.000000e+00> : vector<16x32xf32>
    %14 = tpu.matmul %13, %8, %cst_11 {dimension_numbers = #tpu.dot_dimension_numbers<[1], [0], [0], [1], [0, 0, 1, 1], [], []>} : vector<16x32xbf16>, vector<32x32xbf16>, vector<16x32xf32> -> vector<16x32xf32>
    %cst_12 = arith.constant dense<0.000000e+00> : vector<16x32xf32>
    %15 = tpu.matmul %11, %9, %cst_12 {dimension_numbers = #tpu.dot_dimension_numbers<[1], [0], [0], [1], [0, 0, 1, 1], [], []>} : vector<16x32xbf16>, vector<32x32xbf16>, vector<16x32xf32> -> vector<16x32xf32>
    %16 = arith.addf %14, %15 : vector<16x32xf32>
    %17 = vector.broadcast %10 : vector<1x32xf32> to vector<16x32xf32>
    %18 = arith.addf %16, %17 : vector<16x32xf32>
    %cst_13 = arith.constant 0.000000e+00 : f32
    %19 = vector.broadcast %cst_13 : f32 to vector<16x32xf32>
    %20 = arith.maximumf %18, %19 : vector<16x32xf32>
    %c80 = arith.constant 80 : index
    %c0_14 = arith.constant 0 : index
    %21 = vector.load %arg2[%c80, %c0_14] : memref<464x32xbf16, #tpu.memory_space<vmem>>, vector<32x32xbf16>
    %c112 = arith.constant 112 : index
    %c0_15 = arith.constant 0 : index
    %22 = vector.load %arg2[%c112, %c0_15] : memref<464x32xbf16, #tpu.memory_space<vmem>>, vector<32x32xbf16>
    %c2 = arith.constant 2 : index
    %c0_16 = arith.constant 0 : index
    %23 = vector.load %arg4[%c2, %c0_16] : memref<11x128xf32, #tpu.memory_space<vmem>>, vector<1x32xf32>
    %24 = arith.truncf %20 : vector<16x32xf32> to vector<16x32xbf16>
    %cst_17 = arith.constant dense<0.000000e+00> : vector<16x32xf32>
    %25 = tpu.matmul %0, %24, %cst_17 {dimension_numbers = #tpu.dot_dimension_numbers<[1], [0], [0], [1], [0, 0, 1, 1], [], []>} : vector<16x16xbf16>, vector<16x32xbf16>, vector<16x32xf32> -> vector<16x32xf32>
    %26 = arith.truncf %25 : vector<16x32xf32> to vector<16x32xbf16>
    %cst_18 = arith.constant dense<0.000000e+00> : vector<16x32xf32>
    %27 = tpu.matmul %26, %21, %cst_18 {dimension_numbers = #tpu.dot_dimension_numbers<[1], [0], [0], [1], [0, 0, 1, 1], [], []>} : vector<16x32xbf16>, vector<32x32xbf16>, vector<16x32xf32> -> vector<16x32xf32>
    %cst_19 = arith.constant dense<0.000000e+00> : vector<16x32xf32>
    %28 = tpu.matmul %24, %22, %cst_19 {dimension_numbers = #tpu.dot_dimension_numbers<[1], [0], [0], [1], [0, 0, 1, 1], [], []>} : vector<16x32xbf16>, vector<32x32xbf16>, vector<16x32xf32> -> vector<16x32xf32>
    %29 = arith.addf %27, %28 : vector<16x32xf32>
    %30 = vector.broadcast %23 : vector<1x32xf32> to vector<16x32xf32>
    %31 = arith.addf %29, %30 : vector<16x32xf32>
    %cst_20 = arith.constant 0.000000e+00 : f32
    %32 = vector.broadcast %cst_20 : f32 to vector<16x32xf32>
    %33 = arith.maximumf %31, %32 : vector<16x32xf32>
    %34 = arith.addf %33, %7 : vector<16x32xf32>
    %c144 = arith.constant 144 : index
    %c0_21 = arith.constant 0 : index
    %35 = vector.load %arg2[%c144, %c0_21] : memref<464x32xbf16, #tpu.memory_space<vmem>>, vector<32x32xbf16>
    %c176 = arith.constant 176 : index
    %c0_22 = arith.constant 0 : index
    %36 = vector.load %arg2[%c176, %c0_22] : memref<464x32xbf16, #tpu.memory_space<vmem>>, vector<32x32xbf16>
    %c3 = arith.constant 3 : index
    %c0_23 = arith.constant 0 : index
    %37 = vector.load %arg4[%c3, %c0_23] : memref<11x128xf32, #tpu.memory_space<vmem>>, vector<1x32xf32>
    %38 = arith.truncf %34 : vector<16x32xf32> to vector<16x32xbf16>
    %cst_24 = arith.constant dense<0.000000e+00> : vector<16x32xf32>
    %39 = tpu.matmul %0, %38, %cst_24 {dimension_numbers = #tpu.dot_dimension_numbers<[1], [0], [0], [1], [0, 0, 1, 1], [], []>} : vector<16x16xbf16>, vector<16x32xbf16>, vector<16x32xf32> -> vector<16x32xf32>
    %40 = arith.truncf %39 : vector<16x32xf32> to vector<16x32xbf16>
    %cst_25 = arith.constant dense<0.000000e+00> : vector<16x32xf32>
    %41 = tpu.matmul %40, %35, %cst_25 {dimension_numbers = #tpu.dot_dimension_numbers<[1], [0], [0], [1], [0, 0, 1, 1], [], []>} : vector<16x32xbf16>, vector<32x32xbf16>, vector<16x32xf32> -> vector<16x32xf32>
    %cst_26 = arith.constant dense<0.000000e+00> : vector<16x32xf32>
    %42 = tpu.matmul %38, %36, %cst_26 {dimension_numbers = #tpu.dot_dimension_numbers<[1], [0], [0], [1], [0, 0, 1, 1], [], []>} : vector<16x32xbf16>, vector<32x32xbf16>, vector<16x32xf32> -> vector<16x32xf32>
    %43 = arith.addf %41, %42 : vector<16x32xf32>
    %44 = vector.broadcast %37 : vector<1x32xf32> to vector<16x32xf32>
    %45 = arith.addf %43, %44 : vector<16x32xf32>
    %cst_27 = arith.constant 0.000000e+00 : f32
    %46 = vector.broadcast %cst_27 : f32 to vector<16x32xf32>
    %47 = arith.maximumf %45, %46 : vector<16x32xf32>
    %c208 = arith.constant 208 : index
    %c0_28 = arith.constant 0 : index
    %48 = vector.load %arg2[%c208, %c0_28] : memref<464x32xbf16, #tpu.memory_space<vmem>>, vector<32x32xbf16>
    %c240 = arith.constant 240 : index
    %c0_29 = arith.constant 0 : index
    %49 = vector.load %arg2[%c240, %c0_29] : memref<464x32xbf16, #tpu.memory_space<vmem>>, vector<32x32xbf16>
    %c4 = arith.constant 4 : index
    %c0_30 = arith.constant 0 : index
    %50 = vector.load %arg4[%c4, %c0_30] : memref<11x128xf32, #tpu.memory_space<vmem>>, vector<1x32xf32>
    %51 = arith.truncf %47 : vector<16x32xf32> to vector<16x32xbf16>
    %cst_31 = arith.constant dense<0.000000e+00> : vector<16x32xf32>
    %52 = tpu.matmul %0, %51, %cst_31 {dimension_numbers = #tpu.dot_dimension_numbers<[1], [0], [0], [1], [0, 0, 1, 1], [], []>} : vector<16x16xbf16>, vector<16x32xbf16>, vector<16x32xf32> -> vector<16x32xf32>
    %53 = arith.truncf %52 : vector<16x32xf32> to vector<16x32xbf16>
    %cst_32 = arith.constant dense<0.000000e+00> : vector<16x32xf32>
    %54 = tpu.matmul %53, %48, %cst_32 {dimension_numbers = #tpu.dot_dimension_numbers<[1], [0], [0], [1], [0, 0, 1, 1], [], []>} : vector<16x32xbf16>, vector<32x32xbf16>, vector<16x32xf32> -> vector<16x32xf32>
    %cst_33 = arith.constant dense<0.000000e+00> : vector<16x32xf32>
    %55 = tpu.matmul %51, %49, %cst_33 {dimension_numbers = #tpu.dot_dimension_numbers<[1], [0], [0], [1], [0, 0, 1, 1], [], []>} : vector<16x32xbf16>, vector<32x32xbf16>, vector<16x32xf32> -> vector<16x32xf32>
    %56 = arith.addf %54, %55 : vector<16x32xf32>
    %57 = vector.broadcast %50 : vector<1x32xf32> to vector<16x32xf32>
    %58 = arith.addf %56, %57 : vector<16x32xf32>
    %cst_34 = arith.constant 0.000000e+00 : f32
    %59 = vector.broadcast %cst_34 : f32 to vector<16x32xf32>
    %60 = arith.maximumf %58, %59 : vector<16x32xf32>
    %61 = arith.addf %60, %34 : vector<16x32xf32>
    %62 = arith.truncf %34 : vector<16x32xf32> to vector<16x32xbf16>
    %c400 = arith.constant 400 : index
    %c0_35 = arith.constant 0 : index
    %63 = vector.load %arg2[%c400, %c0_35] : memref<464x32xbf16, #tpu.memory_space<vmem>>, vector<32x32xbf16>
    %cst_36 = arith.constant dense<0.000000e+00> : vector<16x32xf32>
    %64 = tpu.matmul %62, %63, %cst_36 {dimension_numbers = #tpu.dot_dimension_numbers<[1], [0], [0], [1], [0, 0, 1, 1], [], []>} : vector<16x32xbf16>, vector<32x32xbf16>, vector<16x32xf32> -> vector<16x32xf32>
    %c7 = arith.constant 7 : index
    %c0_37 = arith.constant 0 : index
    %65 = vector.load %arg4[%c7, %c0_37] : memref<11x128xf32, #tpu.memory_space<vmem>>, vector<1x32xf32>
    %66 = vector.broadcast %65 : vector<1x32xf32> to vector<16x32xf32>
    %67 = arith.addf %64, %66 : vector<16x32xf32>
    %68 = arith.negf %67 : vector<16x32xf32>
    %69 = math.exp %68 : vector<16x32xf32>
    %cst_38 = arith.constant 1.000000e+00 : f32
    %70 = vector.broadcast %cst_38 : f32 to vector<16x32xf32>
    %71 = arith.addf %70, %69 : vector<16x32xf32>
    %72 = arith.divf %70, %71 : vector<16x32xf32>
    %73 = arith.subf %34, %61 : vector<16x32xf32>
    %74 = arith.mulf %72, %73 : vector<16x32xf32>
    %75 = arith.addf %61, %74 : vector<16x32xf32>
    %c272 = arith.constant 272 : index
    %c0_39 = arith.constant 0 : index
    %76 = vector.load %arg2[%c272, %c0_39] : memref<464x32xbf16, #tpu.memory_space<vmem>>, vector<32x32xbf16>
    %c304 = arith.constant 304 : index
    %c0_40 = arith.constant 0 : index
    %77 = vector.load %arg2[%c304, %c0_40] : memref<464x32xbf16, #tpu.memory_space<vmem>>, vector<32x32xbf16>
    %c5 = arith.constant 5 : index
    %c0_41 = arith.constant 0 : index
    %78 = vector.load %arg4[%c5, %c0_41] : memref<11x128xf32, #tpu.memory_space<vmem>>, vector<1x32xf32>
    %79 = arith.truncf %75 : vector<16x32xf32> to vector<16x32xbf16>
    %cst_42 = arith.constant dense<0.000000e+00> : vector<16x32xf32>
    %80 = tpu.matmul %0, %79, %cst_42 {dimension_numbers = #tpu.dot_dimension_numbers<[1], [0], [0], [1], [0, 0, 1, 1], [], []>} : vector<16x16xbf16>, vector<16x32xbf16>, vector<16x32xf32> -> vector<16x32xf32>
    %81 = arith.truncf %80 : vector<16x32xf32> to vector<16x32xbf16>
    %cst_43 = arith.constant dense<0.000000e+00> : vector<16x32xf32>
    %82 = tpu.matmul %81, %76, %cst_43 {dimension_numbers = #tpu.dot_dimension_numbers<[1], [0], [0], [1], [0, 0, 1, 1], [], []>} : vector<16x32xbf16>, vector<32x32xbf16>, vector<16x32xf32> -> vector<16x32xf32>
    %cst_44 = arith.constant dense<0.000000e+00> : vector<16x32xf32>
    %83 = tpu.matmul %79, %77, %cst_44 {dimension_numbers = #tpu.dot_dimension_numbers<[1], [0], [0], [1], [0, 0, 1, 1], [], []>} : vector<16x32xbf16>, vector<32x32xbf16>, vector<16x32xf32> -> vector<16x32xf32>
    %84 = arith.addf %82, %83 : vector<16x32xf32>
    %85 = vector.broadcast %78 : vector<1x32xf32> to vector<16x32xf32>
    %86 = arith.addf %84, %85 : vector<16x32xf32>
    %cst_45 = arith.constant 0.000000e+00 : f32
    %87 = vector.broadcast %cst_45 : f32 to vector<16x32xf32>
    %88 = arith.maximumf %86, %87 : vector<16x32xf32>
    %c336 = arith.constant 336 : index
    %c0_46 = arith.constant 0 : index
    %89 = vector.load %arg2[%c336, %c0_46] : memref<464x32xbf16, #tpu.memory_space<vmem>>, vector<32x32xbf16>
    %c368 = arith.constant 368 : index
    %c0_47 = arith.constant 0 : index
    %90 = vector.load %arg2[%c368, %c0_47] : memref<464x32xbf16, #tpu.memory_space<vmem>>, vector<32x32xbf16>
    %c6 = arith.constant 6 : index
    %c0_48 = arith.constant 0 : index
    %91 = vector.load %arg4[%c6, %c0_48] : memref<11x128xf32, #tpu.memory_space<vmem>>, vector<1x32xf32>
    %92 = arith.truncf %88 : vector<16x32xf32> to vector<16x32xbf16>
    %cst_49 = arith.constant dense<0.000000e+00> : vector<16x32xf32>
    %93 = tpu.matmul %0, %92, %cst_49 {dimension_numbers = #tpu.dot_dimension_numbers<[1], [0], [0], [1], [0, 0, 1, 1], [], []>} : vector<16x16xbf16>, vector<16x32xbf16>, vector<16x32xf32> -> vector<16x32xf32>
    %94 = arith.truncf %93 : vector<16x32xf32> to vector<16x32xbf16>
    %cst_50 = arith.constant dense<0.000000e+00> : vector<16x32xf32>
    %95 = tpu.matmul %94, %89, %cst_50 {dimension_numbers = #tpu.dot_dimension_numbers<[1], [0], [0], [1], [0, 0, 1, 1], [], []>} : vector<16x32xbf16>, vector<32x32xbf16>, vector<16x32xf32> -> vector<16x32xf32>
    %cst_51 = arith.constant dense<0.000000e+00> : vector<16x32xf32>
    %96 = tpu.matmul %92, %90, %cst_51 {dimension_numbers = #tpu.dot_dimension_numbers<[1], [0], [0], [1], [0, 0, 1, 1], [], []>} : vector<16x32xbf16>, vector<32x32xbf16>, vector<16x32xf32> -> vector<16x32xf32>
    %97 = arith.addf %95, %96 : vector<16x32xf32>
    %98 = vector.broadcast %91 : vector<1x32xf32> to vector<16x32xf32>
    %99 = arith.addf %97, %98 : vector<16x32xf32>
    %cst_52 = arith.constant 0.000000e+00 : f32
    %100 = vector.broadcast %cst_52 : f32 to vector<16x32xf32>
    %101 = arith.maximumf %99, %100 : vector<16x32xf32>
    %102 = arith.addf %101, %75 : vector<16x32xf32>
    %103 = arith.truncf %75 : vector<16x32xf32> to vector<16x32xbf16>
    %c432 = arith.constant 432 : index
    %c0_53 = arith.constant 0 : index
    %104 = vector.load %arg2[%c432, %c0_53] : memref<464x32xbf16, #tpu.memory_space<vmem>>, vector<32x32xbf16>
    %cst_54 = arith.constant dense<0.000000e+00> : vector<16x32xf32>
    %105 = tpu.matmul %103, %104, %cst_54 {dimension_numbers = #tpu.dot_dimension_numbers<[1], [0], [0], [1], [0, 0, 1, 1], [], []>} : vector<16x32xbf16>, vector<32x32xbf16>, vector<16x32xf32> -> vector<16x32xf32>
    %c8 = arith.constant 8 : index
    %c0_55 = arith.constant 0 : index
    %106 = vector.load %arg4[%c8, %c0_55] : memref<11x128xf32, #tpu.memory_space<vmem>>, vector<1x32xf32>
    %107 = vector.broadcast %106 : vector<1x32xf32> to vector<16x32xf32>
    %108 = arith.addf %105, %107 : vector<16x32xf32>
    %109 = arith.negf %108 : vector<16x32xf32>
    %110 = math.exp %109 : vector<16x32xf32>
    %cst_56 = arith.constant 1.000000e+00 : f32
    %111 = vector.broadcast %cst_56 : f32 to vector<16x32xf32>
    %112 = arith.addf %111, %110 : vector<16x32xf32>
    %113 = arith.divf %111, %112 : vector<16x32xf32>
    %114 = arith.subf %75, %102 : vector<16x32xf32>
    %115 = arith.mulf %113, %114 : vector<16x32xf32>
    %116 = arith.addf %102, %115 : vector<16x32xf32>
    %c0_57 = arith.constant 0 : index
    %c0_58 = arith.constant 0 : index
    %117 = vector.load %arg3[%c0_57, %c0_58] : memref<160x128xbf16, #tpu.memory_space<vmem>>, vector<32x128xbf16>
    %c32 = arith.constant 32 : index
    %c0_59 = arith.constant 0 : index
    %118 = vector.load %arg3[%c32, %c0_59] : memref<160x128xbf16, #tpu.memory_space<vmem>>, vector<128x128xbf16>
    %119 = arith.truncf %116 : vector<16x32xf32> to vector<16x32xbf16>
    %cst_60 = arith.constant dense<0.000000e+00> : vector<16x128xf32>
    %120 = tpu.matmul %119, %117, %cst_60 {dimension_numbers = #tpu.dot_dimension_numbers<[1], [0], [0], [1], [0, 0, 1, 1], [], []>} : vector<16x32xbf16>, vector<32x128xbf16>, vector<16x128xf32> -> vector<16x128xf32>
    %c9 = arith.constant 9 : index
    %c0_61 = arith.constant 0 : index
    %121 = vector.load %arg4[%c9, %c0_61] : memref<11x128xf32, #tpu.memory_space<vmem>>, vector<1x128xf32>
    %122 = vector.broadcast %121 : vector<1x128xf32> to vector<16x128xf32>
    %123 = arith.addf %120, %122 : vector<16x128xf32>
    %cst_62 = arith.constant 0.000000e+00 : f32
    %124 = vector.broadcast %cst_62 : f32 to vector<16x128xf32>
    %125 = arith.maximumf %123, %124 : vector<16x128xf32>
    %126 = arith.truncf %125 : vector<16x128xf32> to vector<16x128xbf16>
    %cst_63 = arith.constant dense<0.000000e+00> : vector<16x128xf32>
    %127 = tpu.matmul %126, %118, %cst_63 {dimension_numbers = #tpu.dot_dimension_numbers<[1], [0], [0], [1], [0, 0, 1, 1], [], []>} : vector<16x128xbf16>, vector<128x128xbf16>, vector<16x128xf32> -> vector<16x128xf32>
    %c10 = arith.constant 10 : index
    %c0_64 = arith.constant 0 : index
    %128 = vector.load %arg4[%c10, %c0_64] : memref<11x128xf32, #tpu.memory_space<vmem>>, vector<1x128xf32>
    %129 = vector.broadcast %128 : vector<1x128xf32> to vector<16x128xf32>
    %130 = arith.addf %127, %129 : vector<16x128xf32>
    %c0_65 = arith.constant 0 : index
    %c0_66 = arith.constant 0 : index
    %131 = vector.load %arg5[%c0_65, %c0_66] : memref<16x128xf32, #tpu.memory_space<vmem>>, vector<16x128xf32>
    tpu.vector_store %arg5[%c0_65, %c0_66], %130 {strides = array<i32>} : memref<16x128xf32, #tpu.memory_space<vmem>>, vector<16x128xf32>,
    return
  }
}

</mosaic_0001>

<bundles_post_ra>
// kernel: drgan_forward.1
= control target key start
LH: loop header
LB: loop body
LE: loop exit
PB: predicated region body
PF: predicated region fallthrough
CT: control target
= control target key end

     0   :  { %v1861_v0 = vmov 0.0   ;;  %vm1862_vm0 = vmmov 0   ;;  %vm39_vm1 = vcmask 130048   ;;  %vm156_vm2 = vcmask 261120   ;;  %s2207_s2 = inlined_call_operand.vmem [shape: bf16[464,32], index: 2, kind: input, shape index: {}]   ;;  %s2208_s0 = inlined_call_operand.vmem [shape: f32[16,16], index: 0, kind: input, shape index: {}]   ;;  %s2209_s1 = inlined_call_operand.vmem [shape: bf16[16,16], index: 1, kind: input, shape index: {}]   ;;  %s2210_s4 = inlined_call_operand.vmem [shape: f32[11,128], index: 4, kind: input, shape index: {}]   ;;  %s2211_s3 = inlined_call_operand.vmem [shape: bf16[160,128], index: 3, kind: input, shape index: {}]   ;;  %s2212_s5 = inlined_call_operand.vmem [shape: f32[16,128], index: 5, kind: output, shape index: {}]  }
   0x1   :  { %1621 = vmatprep.subr.bf16.mxu1 %v1861_v0  ;;  %v1805_v1 = vld [vmem:[%s2207_s2] sm:$0xff]   ;;  %1623 = vmatprep.mubr.msk.bf16.mxu1 %vm1862_vm0, %v1861_v0  ;;  %v24_v3 = vld [vmem:[%s2208_s0 + $0x8] sm:$0xff]  ;;  %v1807_v14 = vld [vmem:[%s2207_s2 + $0x18] sm:$0xff]  }
   0x2   :  { %v23_v2 = vld [vmem:[%s2208_s0] sm:$0xff]  ;;  %1649 = vmatprep.subr.bf16.mxu0 %v1861_v0  ;;  %1651 = vmatprep.mubr.msk.bf16.mxu0 %vm1862_vm0, %v1861_v0  ;;  %v1809_v16 = vld [vmem:[%s2207_s2 + $0x8] sm:$0xff]   ;;  %v1810_v17 = vld [vmem:[%s2207_s2 + $0x10] sm:$0xff]  }
   0x3   :  { %1622 = vmatpush3.bf16.msra.mxu1 %v1805_v1  ;;  %v25_v4 = vpack.c.bf16 %v24_v3, %v23_v2  ;;  %v1476_v5 = vld [vmem:[%s2210_s4] ss:$0 sm:$0xff]  ;;  %v1811_v27 = vld [vmem:[%s2207_s2 + $0x38] sm:$0xff]   ;;  %v1487_v29 = vld [vmem:[%s2210_s4 + $0x1] ss:$0 sm:$0xff] }
   0x4   :  { %1627 = vmatprep.subr.bf16.mxu1 %v1861_v0  ;;  %v1924_v13 = vld [vmem:[%s2209_s1] sm:$0xff]   ;;  %v1813_v41 = vld [vmem:[%s2207_s2 + $0x28] sm:$0xff]   ;;  %v1814_v42 = vld [vmem:[%s2207_s2 + $0x30] sm:$0xff]  }
   0x5   :  { %v1808_v15 = vld [vmem:[%s2207_s2 + $0x20] sm:$0xff]   ;;  %v1815_v52 = vld [vmem:[%s2207_s2 + $0x58] sm:$0xff]  }
   0x6   :  { %1624 = vmatmul.mubr.msk.bf16.vlgmr.msra.gmra.mrb[0].mxu1 %vm39_vm1, %v25_v4  ;;  %v1812_v28 = vld [vmem:[%s2207_s2 + $0x40] sm:$0xff]  }
   0x7   :  { %1629 = vmatprep.mubr.msk.bf16.mxu1 %vm1862_vm0, %v1861_v0  ;;  %v1816_v53 = vld [vmem:[%s2207_s2 + $0x60] sm:$0xff]  }
   0x8   :  { %v1495_v54 = vld [vmem:[%s2210_s4 + $0x2] ss:$0 sm:$0xff] }
  0xd9   :  { %v77_v6 = vpop.f32.mrb[0].mxu1 }
  0xda   :  { %v1625_v7 = vpop.f32.mrb[1].mxu1  ;;  %v1915_v9 = vadd.f32 %v1476_v5, %v77_v6  ;;  %v1818_v6 = vld [vmem:[%s2207_s2 + $0x50] sm:$0xff]  }
  0xdb   :  { %v80_v8 = vpop.f32.mrb[2].mxu1 }
  0xdc   :  { %v1917_v10 = vadd.f32 %v1476_v5, %v80_v8  ;;  %v1626_v11 = vpop.f32.mrb[3].mxu1  ;;  %v1817_v5 = vld [vmem:[%s2207_s2 + $0x48] sm:$0xff]  }
  0xde   :  { %v93_v12 = vpack.c.bf16 %v1917_v10, %v1915_v9 }
  0xe0   :  { %1628 = vmatpush3.bf16.msra.mxu1 %v93_v12 }
  0xe1   :  { %1633 = vmatprep.subr.bf16.mxu1 %v1861_v0 }
  0xe3   :  { %1630 = vmatmul.mubr.msk.bf16.vlgmr.msra.gmra.mrb[4].mxu1 %vm39_vm1, %v1924_v13 }
  0xe4   :  { %1634 = vmatpush3.bf16.msra.mxu1 %v1807_v14  ;;  %1637 = vmatprep.mubr.msk.bf16.mxu1 %vm1862_vm0, %v1861_v0 }
  0xe5   :  { %1635 = vmatprep.subr.bf16.mxu1 %v1861_v0 }
  0xe8   :  { %1636 = vmatpush3.bf16.msra.mxu1 %v1808_v15 }
  0xe9   :  { %1641 = vmatprep.subr.bf16.mxu1 %v1861_v0 }
  0xeb   :  { %1638 = vmatmul.mubr.msk.bf16.vlgmr.msra.gmra.mrb[8].mxu1 %vm156_vm2, %v93_v12 }
  0xec   :  { %1642 = vmatpush3.bf16.msra.mxu1 %v1809_v16  ;;  %1645 = vmatprep.mubr.msk.bf16.mxu1 %vm1862_vm0, %v1861_v0 }
  0xed   :  { %1643 = vmatprep.subr.bf16.mxu1 %v1861_v0 }
  0xf0   :  { %1644 = vmatpush3.bf16.msra.mxu1 %v1810_v17  ;;  %v1819_v17 = vld [vmem:[%s2207_s2 + $0x78] sm:$0xff]  }
  0xf1   :  { %1655 = vmatprep.subr.bf16.mxu1 %v1861_v0 }
 0x1b6   :  { %v136_v18 = vpop.f32.mrb[4].mxu1 }
 0x1b7   :  { %v1631_v19 = vpop.f32.mrb[5].mxu1 }
 0x1b8   :  { %v139_v20 = vpop.f32.mrb[6].mxu1  ;;  %v1503_v19 = vld [vmem:[%s2210_s4 + $0x3] ss:$0 sm:$0xff] }
 0x1b9   :  { %v143_v21 = vpack.c.bf16 %v139_v20, %v136_v18  ;;  %v1632_v22 = vpop.f32.mrb[7].mxu1  ;;  %v1820_v18 = vld [vmem:[%s2207_s2 + $0x80] sm:$0xff]  }
 0x1bb   :  { %1646 = vmatmul.mubr.msk.bf16.vlgmr.msra.gmra.mrb[12].mxu1 %vm156_vm2, %v143_v21 }
 0x1bc   :  { %1659 = vmatprep.mubr.msk.bf16.mxu1 %vm1862_vm0, %v1861_v0  ;;  %1656 = vmatpush3.bf16.msra.mxu1 %v1811_v27 }
 0x1bd   :  { %1657 = vmatprep.subr.bf16.mxu1 %v1861_v0 }
 0x1be   :  { %v194_v23 = vpop.f32.mrb[8].mxu1 }
 0x1bf   :  { %v1639_v24 = vpop.f32.mrb[9].mxu1 }
 0x1c0   :  { %v197_v25 = vpop.f32.mrb[10].mxu1  ;;  %1658 = vmatpush3.bf16.msra.mxu1 %v1812_v28 }
 0x1c1   :  { %v1640_v26 = vpop.f32.mrb[11].mxu1  ;;  %1671 = vmatprep.subr.bf16.mxu1 %v1861_v0 }
 0x28e   :  { %v250_v30 = vpop.f32.mrb[12].mxu1 }
 0x28f   :  { %v251_v31 = vadd.f32 %v250_v30, %v194_v23  ;;  %v1647_v32 = vpop.f32.mrb[13].mxu1  ;;  %v1821_v30 = vld [vmem:[%s2207_s2 + $0xc8] sm:$0xff]  }
 0x290   :  { %v253_v33 = vpop.f32.mrb[14].mxu1  ;;  %v1822_v32 = vld [vmem:[%s2207_s2 + $0xd0] sm:$0xff]  }
 0x291   :  { %v261_v34 = vadd.f32 %v1487_v29, %v251_v31  ;;  %v254_v35 = vadd.f32 %v253_v33, %v197_v25  ;;  %v1648_v36 = vpop.f32.mrb[15].mxu1  ;;  %v1823_v33 = vld [vmem:[%s2207_s2 + $0x68] sm:$0xff]  }
 0x293   :  { %v262_v37 = vadd.f32 %v1487_v29, %v254_v35  ;;  %v263_v38 = vmax.f32 %v261_v34, 0.0  ;;  %v1824_v34 = vld [vmem:[%s2207_s2 + $0x70] sm:$0xff]  }
 0x295   :  { %v264_v39 = vmax.f32 %v262_v37, 0.0 }
 0x297   :  { %v274_v40 = vpack.c.bf16 %v264_v39, %v263_v38 }
 0x299   :  { %1650 = vmatpush3.bf16.msra.mxu0 %v274_v40  ;;  %1660 = vmatmul.mubr.msk.bf16.vlgmr.msra.gmra.mrb[16].mxu1 %vm156_vm2, %v274_v40 }
 0x29a   :  { %1663 = vmatprep.subr.bf16.mxu0 %v1861_v0  ;;  %1673 = vmatprep.mubr.msk.bf16.mxu1 %vm1862_vm0, %v1861_v0 }
 0x29c   :  { %1652 = vmatmul.mubr.msk.bf16.vlgmr.msra.gmra.mrb[0].mxu0 %vm39_vm1, %v1924_v13 }
 0x29d   :  { %1667 = vmatprep.mubr.msk.bf16.mxu0 %vm1862_vm0, %v1861_v0  ;;  %1664 = vmatpush3.bf16.msra.mxu0 %v1813_v41 }
 0x29e   :  { %1665 = vmatprep.subr.bf16.mxu0 %v1861_v0 }
 0x2a1   :  { %1666 = vmatpush3.bf16.msra.mxu0 %v1814_v42 }
 0x2a2   :  { %1677 = vmatprep.subr.bf16.mxu0 %v1861_v0 }
 0x36c   :  { %v366_v43 = vpop.f32.mrb[16].mxu1 }
 0x36d   :  { %v1661_v44 = vpop.f32.mrb[17].mxu1 }
 0x36e   :  { %v369_v45 = vpop.f32.mrb[18].mxu1 }
 0x36f   :  { %v309_v46 = vpop.f32.mrb[0].mxu0  ;;  %v1662_v47 = vpop.f32.mrb[19].mxu1 }
 0x370   :  { %v1653_v48 = vpop.f32.mrb[1].mxu0 }
 0x371   :  { %v312_v49 = vpop.f32.mrb[2].mxu0  ;;  %v1825_v48 = vld [vmem:[%s2207_s2 + $0x98] sm:$0xff]  }
 0x372   :  { %v316_v50 = vpack.c.bf16 %v312_v49, %v309_v46  ;;  %v1654_v51 = vpop.f32.mrb[3].mxu0  ;;  %v1826_v49 = vld [vmem:[%s2207_s2 + $0xa0] sm:$0xff]  }
 0x374   :  { %1668 = vmatmul.mubr.msk.bf16.vlgmr.msra.gmra.mrb[4].mxu0 %vm156_vm2, %v316_v50  ;;  %v1512_v50 = vld [vmem:[%s2210_s4 + $0x7] ss:$0 sm:$0xff] }
 0x375   :  { %1681 = vmatprep.mubr.msk.bf16.mxu0 %vm1862_vm0, %v1861_v0  ;;  %1678 = vmatpush3.bf16.msra.mxu0 %v1815_v52 }
 0x376   :  { %1679 = vmatprep.subr.bf16.mxu0 %v1861_v0 }
 0x379   :  { %1680 = vmatpush3.bf16.msra.mxu0 %v1816_v53 }
 0x37a   :  { %1693 = vmatprep.subr.bf16.mxu0 %v1861_v0 }
 0x447   :  { %v422_v55 = vpop.f32.mrb[4].mxu0 }
 0x448   :  { %v423_v56 = vadd.f32 %v422_v55, %v366_v43  ;;  %v1669_v57 = vpop.f32.mrb[5].mxu0 }
 0x449   :  { %v425_v58 = vpop.f32.mrb[6].mxu0 }
 0x44a   :  { %v433_v59 = vadd.f32 %v1495_v54, %v423_v56  ;;  %v426_v60 = vadd.f32 %v425_v58, %v369_v45  ;;  %v1670_v61 = vpop.f32.mrb[7].mxu0 }
 0x44c   :  { %v435_v62 = vmax.f32 %v433_v59, 0.0  ;;  %v434_v63 = vadd.f32 %v1495_v54, %v426_v60  ;;  %v1511_v59 = vld [vmem:[%s2210_s4 + $0x4] ss:$0 sm:$0xff] }
 0x44e   :  { %v436_v1 = vmax.f32 %v434_v63, 0.0  ;;  %v1995_v2 = vadd.f32 %v435_v62, %v1915_v9 }
 0x450   :  { %v1998_v3 = vadd.f32 %v436_v1, %v1917_v10 }
 0x452   :  { %v448_v4 = vpack.c.bf16 %v1998_v3, %v1995_v2 }
 0x454   :  { %1672 = vmatpush3.bf16.msra.mxu1 %v448_v4  ;;  %1682 = vmatmul.mubr.msk.bf16.vlgmr.msra.gmra.mrb[8].mxu0 %vm156_vm2, %v448_v4 }
 0x455   :  { %1685 = vmatprep.subr.bf16.mxu1 %v1861_v0  ;;  %1695 = vmatprep.mubr.msk.bf16.mxu0 %vm1862_vm0, %v1861_v0 }
 0x457   :  { %1674 = vmatmul.mubr.msk.bf16.vlgmr.msra.gmra.mrb[20].mxu1 %vm39_vm1, %v1924_v13 }
 0x458   :  { %1689 = vmatprep.mubr.msk.bf16.mxu1 %vm1862_vm0, %v1861_v0  ;;  %1686 = vmatpush3.bf16.msra.mxu1 %v1817_v5 }
 0x459   :  { %1687 = vmatprep.subr.bf16.mxu1 %v1861_v0 }
 0x45c   :  { %1688 = vmatpush3.bf16.msra.mxu1 %v1818_v6 }
 0x45d   :  { %1699 = vmatprep.subr.bf16.mxu1 %v1861_v0 }
 0x527   :  { %v540_v7 = vpop.f32.mrb[8].mxu0 }
 0x528   :  { %v1683_v8 = vpop.f32.mrb[9].mxu0 }
 0x529   :  { %v543_v9 = vpop.f32.mrb[10].mxu0 }
 0x52a   :  { %v483_v10 = vpop.f32.mrb[20].mxu1  ;;  %v1684_v11 = vpop.f32.mrb[11].mxu0 }
 0x52b   :  { %v1675_v12 = vpop.f32.mrb[21].mxu1 }
 0x52c   :  { %v486_v14 = vpop.f32.mrb[22].mxu1 }
 0x52d   :  { %v490_v15 = vpack.c.bf16 %v486_v14, %v483_v10  ;;  %v1676_v16 = vpop.f32.mrb[23].mxu1 }
 0x52f   :  { %1690 = vmatmul.mubr.msk.bf16.vlgmr.msra.gmra.mrb[24].mxu1 %vm156_vm2, %v490_v15 }
 0x530   :  { %1703 = vmatprep.mubr.msk.bf16.mxu1 %vm1862_vm0, %v1861_v0  ;;  %1700 = vmatpush3.bf16.msra.mxu1 %v1819_v17 }
 0x531   :  { %1701 = vmatprep.subr.bf16.mxu1 %v1861_v0 }
 0x534   :  { %1702 = vmatpush3.bf16.msra.mxu1 %v1820_v18 }
 0x535   :  { %1715 = vmatprep.subr.bf16.mxu1 %v1861_v0 }
 0x602   :  { %v596_v20 = vpop.f32.mrb[24].mxu1 }
 0x603   :  { %v597_v21 = vadd.f32 %v596_v20, %v540_v7  ;;  %v1691_v22 = vpop.f32.mrb[25].mxu1 }
 0x604   :  { %v599_v23 = vpop.f32.mrb[26].mxu1 }
 0x605   :  { %v607_v24 = vadd.f32 %v1503_v19, %v597_v21  ;;  %v600_v25 = vadd.f32 %v599_v23, %v543_v9  ;;  %v1692_v26 = vpop.f32.mrb[27].mxu1 }
 0x607   :  { %v608_v27 = vadd.f32 %v1503_v19, %v600_v25  ;;  %v609_v28 = vmax.f32 %v607_v24, 0.0 }
 0x609   :  { %v610_v29 = vmax.f32 %v608_v27, 0.0 }
 0x60b   :  { %v620_v31 = vpack.c.bf16 %v610_v29, %v609_v28 }
 0x60d   :  { %1694 = vmatpush3.bf16.msra.mxu0 %v620_v31  ;;  %1704 = vmatmul.mubr.msk.bf16.vlgmr.msra.gmra.mrb[28].mxu1 %vm156_vm2, %v620_v31  ;;  %v1830_v31 = vld [vmem:[%s2207_s2 + $0xc0] sm:$0xff]  }
 0x60e   :  { %1716 = vmatpush3.bf16.msra.mxu1 %v1821_v30  ;;  %1719 = vmatprep.mubr.msk.bf16.mxu1 %vm1862_vm0, %v1861_v0  ;;  %v1829_v30 = vld [vmem:[%s2207_s2 + $0xb8] sm:$0xff]  }
 0x60f   :  { %1717 = vmatprep.subr.bf16.mxu1 %v1861_v0  ;;  %1707 = vmatprep.subr.bf16.mxu0 %v1861_v0 }
 0x610   :  { %1696 = vmatmul.mubr.msk.bf16.vlgmr.msra.gmra.mrb[12].mxu0 %vm39_vm1, %v1924_v13 }
 0x611   :  { %1711 = vmatprep.mubr.msk.bf16.mxu0 %vm1862_vm0, %v1861_v0  ;;  %1708 = vmatpush3.bf16.msra.mxu0 %v1823_v33 }
 0x612   :  { %1718 = vmatpush3.bf16.msra.mxu1 %v1822_v32  ;;  %1709 = vmatprep.subr.bf16.mxu0 %v1861_v0  ;;  %v1525_v32 = vld [vmem:[%s2210_s4 + $0x5] ss:$0 sm:$0xff] }
 0x613   :  { %1729 = vmatprep.subr.bf16.mxu1 %v1861_v0 }
 0x615   :  { %1720 = vmatmul.mubr.msk.bf16.vlgmr.msra.gmra.mrb[32].mxu1 %vm156_vm2, %v448_v4  ;;  %1710 = vmatpush3.bf16.msra.mxu0 %v1824_v34 }
 0x616   :  { %1733 = vmatprep.mubr.msk.bf16.mxu1 %vm1862_vm0, %v1861_v0  ;;  %1723 = vmatprep.subr.bf16.mxu0 %v1861_v0 }
 0x617   :  { %1730 = vmatpush3.bf16.msra.mxu1 %v1825_v48 }
 0x618   :  { %1731 = vmatprep.subr.bf16.mxu1 %v1861_v0 }
 0x61b   :  { %1732 = vmatpush3.bf16.msra.mxu1 %v1826_v49 }
 0x61c   :  { %1745 = vmatprep.subr.bf16.mxu1 %v1861_v0 }
 0x6e0   :  { %v712_v35 = vpop.f32.mrb[28].mxu1 }
 0x6e1   :  { %v1705_v36 = vpop.f32.mrb[29].mxu1 }
 0x6e2   :  { %v715_v37 = vpop.f32.mrb[30].mxu1 }
 0x6e3   :  { %v655_v38 = vpop.f32.mrb[12].mxu0  ;;  %v1706_v39 = vpop.f32.mrb[31].mxu1 }
 0x6e4   :  { %v1697_v40 = vpop.f32.mrb[13].mxu0 }
 0x6e5   :  { %v658_v41 = vpop.f32.mrb[14].mxu0 }
 0x6e6   :  { %v662_v42 = vpack.c.bf16 %v658_v41, %v655_v38  ;;  %v1698_v43 = vpop.f32.mrb[15].mxu0 }
 0x6e7   :  { %v1831_v43 = vld [vmem:[%s2207_s2 + $0xd8] sm:$0xff]  }
 0x6e8   :  { %1712 = vmatmul.mubr.msk.bf16.vlgmr.msra.gmra.mrb[16].mxu0 %vm156_vm2, %v662_v42  ;;  %v840_v44 = vpop.f32.mrb[32].mxu1 }
 0x6e9   :  { %v1721_v45 = vpop.f32.mrb[33].mxu1  ;;  %1725 = vmatprep.mubr.msk.bf16.mxu0 %vm1862_vm0, %v1861_v0  ;;  %v841_v51 = vadd.f32 %v1512_v50, %v840_v44 }
 0x6ea   :  { %v843_v46 = vpop.f32.mrb[34].mxu1  ;;  %v1832_v45 = vld [vmem:[%s2207_s2 + $0xe0] sm:$0xff]  }
 0x6eb   :  { %v1722_v47 = vpop.f32.mrb[35].mxu1  ;;  %v844_v52 = vadd.f32 %v1512_v50, %v843_v46  ;;  %v1516_v53 = vmul.f32 -1.442695, %v841_v51  ;;  %v1833_v46 = vld [vmem:[%s2207_s2 + $0xa8] sm:$0xff]  }
 0x6ed   :  { %v1517_v54 = vmul.f32 -1.442695, %v844_v52  ;;  %1845 = vpow2.f32 %v1516_v53 }
 0x6ef   :  { %1847 = vpow2.f32 %v1517_v54 }
 0x6f7   :  { %v1846_v55 = vpop.eup %1845 }
 0x6f8   :  { %v853_v57 = vadd.f32 1.0, %v1846_v55 }
 0x6f9   :  { %v1848_v56 = vpop.eup %1847 }
 0x6fa   :  { %v854_v58 = vadd.f32 1.0, %v1848_v56  ;;  %1849 = vrcp.f32 %v853_v57 }
 0x6fc   :  { %1851 = vrcp.f32 %v854_v58 }
 0x704   :  { %v1850_v12 = vpop.eup %1849 }
 0x706   :  { %v1852_v16 = vpop.eup %1851 }
 0x7bb   :  { %v768_v60 = vpop.f32.mrb[16].mxu0 }
 0x7bc   :  { %v769_v61 = vadd.f32 %v768_v60, %v712_v35  ;;  %v1713_v62 = vpop.f32.mrb[17].mxu0  ;;  %v1835_v60 = vld [vmem:[%s2211_s3] sm:$0xff]  }
 0x7bd   :  { %v771_v63 = vpop.f32.mrb[18].mxu0  ;;  %v1837_v62 = vld [vmem:[%s2211_s3 + $0x10] sm:$0xff]  }
 0x7be   :  { %v779_v1 = vadd.f32 %v1511_v59, %v769_v61  ;;  %v772_v4 = vadd.f32 %v771_v63, %v715_v37  ;;  %v1714_v5 = vpop.f32.mrb[19].mxu0  ;;  %v1836_v61 = vld [vmem:[%s2211_s3 + $0x8] sm:$0xff]   ;;  %v1838_v63 = vld [vmem:[%s2211_s3 + $0x18] sm:$0xff]  }
 0x7bf   :  { %v1841_v5 = vld [vmem:[%s2211_s3 + $0x30] sm:$0xff]  }
 0x7c0   :  { %v781_v6 = vmax.f32 %v779_v1, 0.0  ;;  %v780_v7 = vadd.f32 %v1511_v59, %v772_v4  ;;  %v1839_v1 = vld [vmem:[%s2211_s3 + $0x20] sm:$0xff]   ;;  %v1840_v4 = vld [vmem:[%s2211_s3 + $0x28] sm:$0xff]  }
 0x7c2   :  { %v783_v8 = vadd.f32 %v781_v6, %v1995_v2  ;;  %v782_v9 = vmax.f32 %v780_v7, 0.0  ;;  %v1842_v6 = vld [vmem:[%s2211_s3 + $0x38] sm:$0xff]   ;;  %v1534_v7 = vld [vmem:[%s2210_s4 + $0x8] ss:$0 sm:$0xff] }
 0x7c4   :  { %v859_v10 = vsub.f32 %v1995_v2, %v783_v8  ;;  %v784_v11 = vadd.f32 %v782_v9, %v1998_v3  ;;  %v1827_v2 = vld [vmem:[%s2207_s2 + $0x88] sm:$0xff]  }
 0x7c6   :  { %v861_v14 = vmul.f32 %v1850_v12, %v859_v10  ;;  %v860_v15 = vsub.f32 %v1998_v3, %v784_v11  ;;  %v1828_v3 = vld [vmem:[%s2207_s2 + $0x90] sm:$0xff]  }
 0x7c8   :  { %v2080_v17 = vadd.f32 %v861_v14, %v783_v8  ;;  %v862_v18 = vmul.f32 %v1852_v16, %v860_v15 }
 0x7ca   :  { %v2082_v19 = vadd.f32 %v862_v18, %v784_v11  ;;  %v1533_v18 = vld [vmem:[%s2210_s4 + $0x6] ss:$0 sm:$0xff] }
 0x7cc   :  { %v874_v20 = vpack.c.bf16 %v2082_v19, %v2080_v17 }
 0x7ce   :  { %1724 = vmatpush3.bf16.msra.mxu0 %v874_v20  ;;  %1734 = vmatmul.mubr.msk.bf16.vlgmr.msra.gmra.mrb[36].mxu1 %vm156_vm2, %v874_v20 }
 0x7cf   :  { %1737 = vmatprep.subr.bf16.mxu0 %v1861_v0  ;;  %1747 = vmatprep.mubr.msk.bf16.mxu1 %vm1862_vm0, %v1861_v0 }
 0x7d1   :  { %1726 = vmatmul.mubr.msk.bf16.vlgmr.msra.gmra.mrb[20].mxu0 %vm39_vm1, %v1924_v13 }
 0x7d2   :  { %1741 = vmatprep.mubr.msk.bf16.mxu0 %vm1862_vm0, %v1861_v0  ;;  %1738 = vmatpush3.bf16.msra.mxu0 %v1827_v2 }
 0x7d3   :  { %1739 = vmatprep.subr.bf16.mxu0 %v1861_v0 }
 0x7d6   :  { %1740 = vmatpush3.bf16.msra.mxu0 %v1828_v3 }
 0x7d7   :  { %1751 = vmatprep.subr.bf16.mxu0 %v1861_v0 }
 0x8a1   :  { %v966_v21 = vpop.f32.mrb[36].mxu1 }
 0x8a2   :  { %v1735_v22 = vpop.f32.mrb[37].mxu1 }
 0x8a3   :  { %v969_v23 = vpop.f32.mrb[38].mxu1 }
 0x8a4   :  { %v909_v24 = vpop.f32.mrb[20].mxu0  ;;  %v1736_v25 = vpop.f32.mrb[39].mxu1 }
 0x8a5   :  { %v1727_v26 = vpop.f32.mrb[21].mxu0 }
 0x8a6   :  { %v912_v27 = vpop.f32.mrb[22].mxu0 }
 0x8a7   :  { %v916_v28 = vpack.c.bf16 %v912_v27, %v909_v24  ;;  %v1728_v29 = vpop.f32.mrb[23].mxu0 }
 0x8a9   :  { %1742 = vmatmul.mubr.msk.bf16.vlgmr.msra.gmra.mrb[24].mxu0 %vm156_vm2, %v916_v28 }
 0x8aa   :  { %1755 = vmatprep.mubr.msk.bf16.mxu0 %vm1862_vm0, %v1861_v0  ;;  %1752 = vmatpush3.bf16.msra.mxu0 %v1829_v30 }
 0x8ab   :  { %1753 = vmatprep.subr.bf16.mxu0 %v1861_v0 }
 0x8ae   :  { %1754 = vmatpush3.bf16.msra.mxu0 %v1830_v31 }
 0x8af   :  { %1767 = vmatprep.subr.bf16.mxu0 %v1861_v0 }
 0x97c   :  { %v1022_v33 = vpop.f32.mrb[24].mxu0 }
 0x97d   :  { %v1023_v34 = vadd.f32 %v1022_v33, %v966_v21  ;;  %v1743_v35 = vpop.f32.mrb[25].mxu0 }
 0x97e   :  { %v1025_v36 = vpop.f32.mrb[26].mxu0 }
 0x97f   :  { %v1033_v37 = vadd.f32 %v1525_v32, %v1023_v34  ;;  %v1026_v38 = vadd.f32 %v1025_v36, %v969_v23  ;;  %v1744_v39 = vpop.f32.mrb[27].mxu0 }
 0x980   :  { %v1843_v39 = vld [vmem:[%s2211_s3 + $0x40] sm:$0xff]  }
 0x981   :  { %v1034_v40 = vadd.f32 %v1525_v32, %v1026_v38  ;;  %v1035_v41 = vmax.f32 %v1033_v37, 0.0 }
 0x983   :  { %v1036_v42 = vmax.f32 %v1034_v40, 0.0 }
 0x985   :  { %v1046_v44 = vpack.c.bf16 %v1036_v42, %v1035_v41 }
 0x987   :  { %1746 = vmatpush3.bf16.msra.mxu1 %v1046_v44  ;;  %1756 = vmatmul.mubr.msk.bf16.vlgmr.msra.gmra.mrb[28].mxu0 %vm156_vm2, %v1046_v44 }
 0x988   :  { %1768 = vmatpush3.bf16.msra.mxu0 %v1831_v43  ;;  %1771 = vmatprep.mubr.msk.bf16.mxu0 %vm1862_vm0, %v1861_v0 }
 0x989   :  { %1769 = vmatprep.subr.bf16.mxu0 %v1861_v0  ;;  %1759 = vmatprep.subr.bf16.mxu1 %v1861_v0 }
 0x98a   :  { %1748 = vmatmul.mubr.msk.bf16.vlgmr.msra.gmra.mrb[40].mxu1 %vm39_vm1, %v1924_v13  ;;  %v1834_v13 = vld [vmem:[%s2207_s2 + $0xb0] sm:$0xff]  }
 0x98b   :  { %1763 = vmatprep.mubr.msk.bf16.mxu1 %vm1862_vm0, %v1861_v0  ;;  %1760 = vmatpush3.bf16.msra.mxu1 %v1833_v46 }
 0x98c   :  { %1770 = vmatpush3.bf16.msra.mxu0 %v1832_v45  ;;  %1761 = vmatprep.subr.bf16.mxu1 %v1861_v0 }
 0x98d   :  { %1783 = vmatprep.subr.bf16.mxu0 %v1861_v0 }
 0x98f   :  { %1772 = vmatmul.mubr.msk.bf16.vlgmr.msra.gmra.mrb[32].mxu0 %vm156_vm2, %v874_v20  ;;  %1762 = vmatpush3.bf16.msra.mxu1 %v1834_v13 }
 0x990   :  { %1799 = vmatprep.mubr.msk.bf16.mxu0 %vm1862_vm0, %v1861_v0  ;;  %1775 = vmatprep.subr.bf16.mxu1 %v1861_v0 }
 0x991   :  { %1784 = vmatpush3.bf16.msra.mxu0 %v1837_v62 }
 0x992   :  { %1785 = vmatprep.subr.bf16.mxu0 %v1861_v0 }
 0x995   :  { %1786 = vmatpush3.bf16.msra.mxu0 %v1838_v63 }
 0x996   :  { %1787 = vmatprep.subr.bf16.mxu0 %v1861_v0 }
 0x999   :  { %1788 = vmatpush3.bf16.msra.mxu0 %v1839_v1 }
 0x99a   :  { %1789 = vmatprep.subr.bf16.mxu0 %v1861_v0 }
 0x99d   :  { %1790 = vmatpush3.bf16.msra.mxu0 %v1840_v4 }
 0x99e   :  { %1791 = vmatprep.subr.bf16.mxu0 %v1861_v0 }
 0x9a1   :  { %1792 = vmatpush3.bf16.msra.mxu0 %v1841_v5 }
 0x9a2   :  { %1793 = vmatprep.subr.bf16.mxu0 %v1861_v0 }
 0x9a5   :  { %1794 = vmatpush3.bf16.msra.mxu0 %v1842_v6 }
 0x9a6   :  { %1795 = vmatprep.subr.bf16.mxu0 %v1861_v0 }
 0x9a9   :  { %1796 = vmatpush3.bf16.msra.mxu0 %v1843_v39 }
 0x9aa   :  { %1797 = vmatprep.subr.bf16.mxu0 %v1861_v0 }
 0xa5a   :  { %v1138_v47 = vpop.f32.mrb[28].mxu0 }
 0xa5b   :  { %v1757_v48 = vpop.f32.mrb[29].mxu0 }
 0xa5c   :  { %v1141_v49 = vpop.f32.mrb[30].mxu0 }
 0xa5d   :  { %v1081_v50 = vpop.f32.mrb[40].mxu1  ;;  %v1758_v51 = vpop.f32.mrb[31].mxu0 }
 0xa5e   :  { %v1749_v52 = vpop.f32.mrb[41].mxu1 }
 0xa5f   :  { %v1084_v53 = vpop.f32.mrb[42].mxu1 }
 0xa60   :  { %v1088_v54 = vpack.c.bf16 %v1084_v53, %v1081_v50  ;;  %v1750_v55 = vpop.f32.mrb[43].mxu1 }
 0xa62   :  { %1764 = vmatmul.mubr.msk.bf16.vlgmr.msra.gmra.mrb[44].mxu1 %vm156_vm2, %v1088_v54  ;;  %v1266_v56 = vpop.f32.mrb[32].mxu0 }
 0xa63   :  { %v1773_v57 = vpop.f32.mrb[33].mxu0  ;;  %1779 = vmatprep.mubr.msk.bf16.mxu1 %vm1862_vm0, %v1861_v0  ;;  %1776 = vmatpush3.bf16.msra.mxu1 %v1835_v60  ;;  %v1267_v8 = vadd.f32 %v1534_v7, %v1266_v56 }
 0xa64   :  { %v1269_v58 = vpop.f32.mrb[34].mxu0  ;;  %1777 = vmatprep.subr.bf16.mxu1 %v1861_v0  ;;  %v1544_v0 = vld [vmem:[%s2210_s4 + $0xa] ss:$0 sm:$0xff] }
 0xa65   :  { %v1774_v59 = vpop.f32.mrb[35].mxu0  ;;  %v1270_v9 = vadd.f32 %v1534_v7, %v1269_v58  ;;  %v1538_v10 = vmul.f32 -1.442695, %v1267_v8 }
 0xa67   :  { %1778 = vmatpush3.bf16.msra.mxu1 %v1836_v61  ;;  %v1539_v11 = vmul.f32 -1.442695, %v1270_v9  ;;  %1853 = vpow2.f32 %v1538_v10 }
 0xa69   :  { %1855 = vpow2.f32 %v1539_v11 }
 0xa71   :  { %v1854_v12 = vpop.eup %1853 }
 0xa72   :  { %v1279_v15 = vadd.f32 1.0, %v1854_v12 }
 0xa73   :  { %v1856_v14 = vpop.eup %1855 }
 0xa74   :  { %v1280_v16 = vadd.f32 1.0, %v1856_v14  ;;  %1857 = vrcp.f32 %v1279_v15 }
 0xa76   :  { %1859 = vrcp.f32 %v1280_v16 }
 0xa7e   :  { %v1858_v31 = vpop.eup %1857 }
 0xa80   :  { %v1860_v34 = vpop.eup %1859 }
 0xb35   :  { %v1194_v20 = vpop.f32.mrb[44].mxu1 }
 0xb36   :  { %v1195_v2 = vadd.f32 %v1194_v20, %v1138_v47  ;;  %v1765_v3 = vpop.f32.mrb[45].mxu1 }
 0xb37   :  { %v1197_v21 = vpop.f32.mrb[46].mxu1 }
 0xb38   :  { %v1205_v22 = vadd.f32 %v1533_v18, %v1195_v2  ;;  %v1198_v23 = vadd.f32 %v1197_v21, %v1141_v49  ;;  %v1766_v24 = vpop.f32.mrb[47].mxu1 }
 0xb3a   :  { %v1207_v25 = vmax.f32 %v1205_v22, 0.0  ;;  %v1206_v26 = vadd.f32 %v1533_v18, %v1198_v23 }
 0xb3c   :  { %v1209_v27 = vadd.f32 %v1207_v25, %v2080_v17  ;;  %v1208_v28 = vmax.f32 %v1206_v26, 0.0 }
 0xb3e   :  { %v1285_v29 = vsub.f32 %v2080_v17, %v1209_v27  ;;  %v1210_v30 = vadd.f32 %v1208_v28, %v2082_v19  ;;  %v1844_v17 = vld [vmem:[%s2211_s3 + $0x48] sm:$0xff]  }
 0xb3f   :  { %1798 = vmatpush3.bf16.msra.mxu0 %v1844_v17 }
 0xb40   :  { %v1287_v32 = vmul.f32 %v1858_v31, %v1285_v29  ;;  %v1286_v33 = vsub.f32 %v2082_v19, %v1210_v30  ;;  %v1540_v19 = vld [vmem:[%s2210_s4 + $0x9] ss:$0 sm:$0xff] }
 0xb42   :  { %v1289_v35 = vadd.f32 %v1287_v32, %v1209_v27  ;;  %v1288_v36 = vmul.f32 %v1860_v34, %v1286_v33 }
 0xb44   :  { %v1290_v37 = vadd.f32 %v1288_v36, %v1210_v30 }
 0xb46   :  { %v1311_v38 = vpack.c.bf16 %v1290_v37, %v1289_v35 }
 0xb48   :  { %1780 = vmatmul.mubr.msk.bf16.vlgmr.msra.gmra.mrb[48].mxu1 %vm156_vm2, %v1311_v38 }
 0xc1b   :  { %v1366_v40 = vpop.f32.mrb[48].mxu1 }
 0xc1c   :  { %v1367_v41 = vadd.f32 %v1540_v19, %v1366_v40  ;;  %v1781_v42 = vpop.f32.mrb[49].mxu1 }
 0xc1d   :  { %v1369_v43 = vpop.f32.mrb[50].mxu1 }
 0xc1e   :  { %v1370_v44 = vadd.f32 %v1540_v19, %v1369_v43  ;;  %v1782_v45 = vpop.f32.mrb[51].mxu1  ;;  %v1373_v46 = vmax.f32 %v1367_v41, 0.0 }
 0xc20   :  { %v1374_v13 = vmax.f32 %v1370_v44, 0.0 }
 0xc22   :  { %v1375_v47 = vpack.c.bf16 %v1374_v13, %v1373_v46 }
 0xc24   :  { %1800 = vmatmul.mubr.bf16.vlgmr.msra.gmra.mrb[36].mxu0 %v1375_v47 }
 0xcf7   :  { %v1463_v48 = vpop.f32.mrb[36].mxu0 }
 0xcf8   :  { %v1464_v49 = vadd.f32 %v1544_v0, %v1463_v48  ;;  %v1801_v50 = vpop.f32.mrb[37].mxu0 }
 0xcf9   :  { %v1466_v51 = vpop.f32.mrb[38].mxu0 }
 0xcfa   :  { %1470 = vst [vmem:[%s2212_s5] sm:$0xff] %v1464_v49  ;;  %v1467_v52 = vadd.f32 %v1544_v0, %v1466_v51  ;;  %v1802_v53 = vpop.f32.mrb[39].mxu0 }
 0xcfc   :  { %1471 = vst [vmem:[%s2212_s5 + $0x8] sm:$0xff] %v1467_v52 }

</bundles_post_ra>
